<compile_context>
chip_gen: v5e
topology: v5e:2x2
jax: 0.10.0
libtpu: 0.0.40
codegen_flags: <defaults>
</compile_context>

<pallas_src>
import functools

import jax
import jax.numpy as jnp
from jax.experimental import pallas as pl
from jax.experimental.pallas import tpu as pltpu

LANE = 128          # pad feature dims to a multiple of the 128-wide lane axis
SUBLANE_BF16 = 16   # bf16 sublane packing: pad node count to a multiple of 16


def _round_up(v, m):
    return (v + m - 1) // m * m


# ----------------------------- Pallas kernel --------------------------------
def _fused_sage_kernel(a_ref, x_ref, w1_ref, b1_ref, w2_ref, b2_ref, out_ref,
                       cat_ref, h_ref, z_ref, *, fin_p, out_p):
    a = a_ref[...]                       # (Np, Np)  bf16 row-normalized adjacency
    x = x_ref[...]                       # (Np, Fp)  bf16 node features

    # ---- layer 1: h = relu( [A@X , X] @ [W_l1 ; W_r1] + b1 ) --------------
    agg = jnp.dot(a, x, preferred_element_type=jnp.float32)      # mean aggregation
    cat_ref[:, :fin_p] = agg.astype(jnp.bfloat16)                # [agg | x] in VMEM
    cat_ref[:, fin_p:] = x
    h = jnp.dot(cat_ref[...], w1_ref[...], preferred_element_type=jnp.float32)
    h = jnp.maximum(h + b1_ref[...], 0.0)
    h_ref[...] = h.astype(jnp.bfloat16)                          # h stays in VMEM

    # ---- layer 2 (reassociated): out = A @ (h @ W_l2) + h @ W_r2 + b2 -----
    z_ref[...] = jnp.dot(h_ref[...], w2_ref[...],
                         preferred_element_type=jnp.float32)     # (Np, 2*Op)
    z_l = z_ref[:, :out_p].astype(jnp.bfloat16)
    z_r = z_ref[:, out_p:]
    out_ref[...] = (jnp.dot(a, z_l, preferred_element_type=jnp.float32)
                    + z_r + b2_ref[...])


def _fused_sage_call(a_bf, x_bf, w1, b1, w2, b2):
    n_p = a_bf.shape[0]
    fin_p = x_bf.shape[1]
    hid_p = w1.shape[1]
    out_p = b2.shape[1]
    kernel = functools.partial(_fused_sage_kernel, fin_p=fin_p, out_p=out_p)
    return pl.pallas_call(
        kernel,
        out_shape=jax.ShapeDtypeStruct((n_p, out_p), jnp.float32),
        in_specs=[pl.BlockSpec(memory_space=pltpu.MemorySpace.VMEM)] * 6,
        out_specs=pl.BlockSpec(memory_space=pltpu.MemorySpace.VMEM),
        scratch_shapes=[
            pltpu.VMEM((n_p, 2 * fin_p), jnp.bfloat16),   # [A@X , X] concat buffer
            pltpu.VMEM((n_p, hid_p), jnp.bfloat16),       # layer-1 output h
            pltpu.VMEM((n_p, 2 * out_p), jnp.float32),    # h @ [W_l2 | W_r2]
        ],
    )(a_bf, x_bf, w1, b1, w2, b2)


# ------------------------------- glue (JAX) ---------------------------------
def build_mean_adjacency(edge_index, num_nodes_padded):
    """Row-normalized adjacency: A[i, j] = (#edges j->i) / in_degree(i); zero rows stay 0."""
    src = edge_index[0]
    dst = edge_index[1]
    a = jnp.zeros((num_nodes_padded, num_nodes_padded), jnp.float32)
    a = a.at[dst, src].add(1.0)
    deg = a.sum(axis=1, keepdims=True)
    return a / jnp.maximum(deg, 1.0)


def init_params(key, in_channels, hidden_channels, out_channels):
    """Deterministic, PyTorch-Linear-style uniform init. Weights stored as (Fin, Fout)."""
    ks = jax.random.split(key, 6)

    def lin_w(k, fi, fo):
        lim = 1.0 / (fi ** 0.5)
        return jax.random.uniform(k, (fi, fo), jnp.float32, -lim, lim)

    def lin_b(k, fi, fo):
        lim = 1.0 / (fi ** 0.5)
        return jax.random.uniform(k, (1, fo), jnp.float32, -lim, lim)

    return {
        "w_l1": lin_w(ks[0], in_channels, hidden_channels),
        "w_r1": lin_w(ks[1], in_channels, hidden_channels),
        "b1": lin_b(ks[2], in_channels, hidden_channels),
        "w_l2": lin_w(ks[3], hidden_channels, out_channels),
        "w_r2": lin_w(ks[4], hidden_channels, out_channels),
        "b2": lin_b(ks[5], hidden_channels, out_channels),
    }
    # TODO(synk): edge_mlp / predict_prob are not exercised by forward(); not implemented here.


@jax.jit
def movie_recommender_forward(params, x, edge_index):
    n, in_c = x.shape
    hid_c = params["w_l1"].shape[1]
    out_c = params["w_l2"].shape[1]

    n_p = _round_up(n, SUBLANE_BF16)
    fin_p = _round_up(in_c, LANE)
    hid_p = _round_up(hid_c, LANE)
    out_p = _round_up(out_c, LANE)

    # Dense mean-aggregation operator at padded size (padded rows/cols stay zero,
    # so padded nodes never leak into real rows). bf16 operand, f32 accumulate.
    a_bf = build_mean_adjacency(edge_index, n_p).astype(jnp.bfloat16)

    # Zero-pad features/weights to lane-dense widths and cast to bf16 at the boundary.
    x_p = jnp.zeros((n_p, fin_p), jnp.float32).at[:n, :in_c].set(x).astype(jnp.bfloat16)

    # Merged layer-1 weights: [W_l1 ; W_r1] stacked along K (rows).
    w1 = jnp.zeros((2 * fin_p, hid_p), jnp.float32)
    w1 = w1.at[:in_c, :hid_c].set(params["w_l1"])
    w1 = w1.at[fin_p:fin_p + in_c, :hid_c].set(params["w_r1"])
    b1 = jnp.zeros((1, hid_p), jnp.float32).at[:, :hid_c].set(params["b1"])

    # Merged layer-2 weights: [W_l2 | W_r2] concatenated along N (output cols).
    w2 = jnp.zeros((hid_p, 2 * out_p), jnp.float32)
    w2 = w2.at[:hid_c, :out_c].set(params["w_l2"])
    w2 = w2.at[:hid_c, out_p:out_p + out_c].set(params["w_r2"])
    b2 = jnp.zeros((1, out_p), jnp.float32).at[:, :out_c].set(params["b2"])

    out_padded = _fused_sage_call(a_bf, x_p,
                                  w1.astype(jnp.bfloat16), b1,
                                  w2.astype(jnp.bfloat16), b2)
    return out_padded[:n, :out_c]


# --------------------------------- main --------------------------------------
if __name__ == "__main__":
    N_NODES = 16
    N_EDGES = 32
    IN_C, HID_C, OUT_C = 8, 32, 16

    root = jax.random.PRNGKey(0)
    k_x, k_src, k_dst, k_params = jax.random.split(root, 4)

    x = jax.random.normal(k_x, (N_NODES, IN_C), jnp.float32)
    src = jax.random.randint(k_src, (N_EDGES,), 0, N_NODES, jnp.int32)
    dst = jax.random.randint(k_dst, (N_EDGES,), 0, N_NODES, jnp.int32)
    edge_index = jnp.stack([src, dst], axis=0)  # (2, E)

    params = init_params(k_params, IN_C, HID_C, OUT_C)

    out = movie_recommender_forward(params, x, edge_index)
    jax.block_until_ready(out)

    assert out.shape == (N_NODES, OUT_C) and out.dtype == jnp.float32
    print("KERNEL_OK")
</pallas_src>

<mosaic_0001>
module attributes {stable_mosaic.version = 11 : i64} {
  func.func @_fused_sage_kernel(%arg0: memref<16x16xbf16, #tpu.memory_space<vmem>>, %arg1: memref<16x128xbf16, #tpu.memory_space<vmem>>, %arg2: memref<256x128xbf16, #tpu.memory_space<vmem>>, %arg3: memref<1x128xf32, #tpu.memory_space<vmem>>, %arg4: memref<128x256xbf16, #tpu.memory_space<vmem>>, %arg5: memref<1x128xf32, #tpu.memory_space<vmem>>, %arg6: memref<16x128xf32, #tpu.memory_space<vmem>>, %arg7: memref<16x256xbf16, #tpu.memory_space<vmem>>, %arg8: memref<16x128xbf16, #tpu.memory_space<vmem>>, %arg9: memref<16x256xf32, #tpu.memory_space<vmem>>) attributes {dimension_semantics = [], scalar_prefetch = 0 : i64, scratch_operands = 3 : i64, tpu.core_type = #tpu.core_type<tc>} {
    %c0 = arith.constant 0 : index
    %c0_0 = arith.constant 0 : index
    %0 = vector.load %arg0[%c0, %c0_0] : memref<16x16xbf16, #tpu.memory_space<vmem>>, vector<16x16xbf16>
    %c0_1 = arith.constant 0 : index
    %c0_2 = arith.constant 0 : index
    %1 = vector.load %arg1[%c0_1, %c0_2] : memref<16x128xbf16, #tpu.memory_space<vmem>>, vector<16x128xbf16>
    %cst = arith.constant dense<0.000000e+00> : vector<16x128xf32>
    %2 = tpu.matmul %0, %1, %cst {dimension_numbers = #tpu.dot_dimension_numbers<[1], [0], [0], [1], [0, 0, 1, 1], [], []>} : vector<16x16xbf16>, vector<16x128xbf16>, vector<16x128xf32> -> vector<16x128xf32>
    %3 = arith.truncf %2 : vector<16x128xf32> to vector<16x128xbf16>
    %c0_3 = arith.constant 0 : index
    %c0_4 = arith.constant 0 : index
    %4 = vector.load %arg7[%c0_3, %c0_4] : memref<16x256xbf16, #tpu.memory_space<vmem>>, vector<16x128xbf16>
    tpu.vector_store %arg7[%c0_3, %c0_4], %3 {strides = array<i32>} : memref<16x256xbf16, #tpu.memory_space<vmem>>, vector<16x128xbf16>,
    %c0_5 = arith.constant 0 : index
    %c128 = arith.constant 128 : index
    %5 = vector.load %arg7[%c0_5, %c128] : memref<16x256xbf16, #tpu.memory_space<vmem>>, vector<16x128xbf16>
    tpu.vector_store %arg7[%c0_5, %c128], %1 {strides = array<i32>} : memref<16x256xbf16, #tpu.memory_space<vmem>>, vector<16x128xbf16>,
    %c0_6 = arith.constant 0 : index
    %c0_7 = arith.constant 0 : index
    %6 = vector.load %arg7[%c0_6, %c0_7] : memref<16x256xbf16, #tpu.memory_space<vmem>>, vector<16x256xbf16>
    %c0_8 = arith.constant 0 : index
    %c0_9 = arith.constant 0 : index
    %7 = vector.load %arg2[%c0_8, %c0_9] : memref<256x128xbf16, #tpu.memory_space<vmem>>, vector<256x128xbf16>
    %cst_10 = arith.constant dense<0.000000e+00> : vector<16x128xf32>
    %8 = tpu.matmul %6, %7, %cst_10 {dimension_numbers = #tpu.dot_dimension_numbers<[1], [0], [0], [1], [0, 0, 1, 1], [], []>} : vector<16x256xbf16>, vector<256x128xbf16>, vector<16x128xf32> -> vector<16x128xf32>
    %c0_11 = arith.constant 0 : index
    %c0_12 = arith.constant 0 : index
    %9 = vector.load %arg3[%c0_11, %c0_12] : memref<1x128xf32, #tpu.memory_space<vmem>>, vector<1x128xf32>
    %10 = vector.broadcast %9 : vector<1x128xf32> to vector<16x128xf32>
    %11 = arith.addf %8, %10 : vector<16x128xf32>
    %cst_13 = arith.constant 0.000000e+00 : f32
    %12 = vector.broadcast %cst_13 : f32 to vector<16x128xf32>
    %13 = arith.maximumf %11, %12 : vector<16x128xf32>
    %14 = arith.truncf %13 : vector<16x128xf32> to vector<16x128xbf16>
    %c0_14 = arith.constant 0 : index
    %c0_15 = arith.constant 0 : index
    %15 = vector.load %arg8[%c0_14, %c0_15] : memref<16x128xbf16, #tpu.memory_space<vmem>>, vector<16x128xbf16>
    tpu.vector_store %arg8[%c0_14, %c0_15], %14 {strides = array<i32>} : memref<16x128xbf16, #tpu.memory_space<vmem>>, vector<16x128xbf16>,
    %c0_16 = arith.constant 0 : index
    %c0_17 = arith.constant 0 : index
    %16 = vector.load %arg8[%c0_16, %c0_17] : memref<16x128xbf16, #tpu.memory_space<vmem>>, vector<16x128xbf16>
    %c0_18 = arith.constant 0 : index
    %c0_19 = arith.constant 0 : index
    %17 = vector.load %arg4[%c0_18, %c0_19] : memref<128x256xbf16, #tpu.memory_space<vmem>>, vector<128x256xbf16>
    %cst_20 = arith.constant dense<0.000000e+00> : vector<16x256xf32>
    %18 = tpu.matmul %16, %17, %cst_20 {dimension_numbers = #tpu.dot_dimension_numbers<[1], [0], [0], [1], [0, 0, 1, 1], [], []>} : vector<16x128xbf16>, vector<128x256xbf16>, vector<16x256xf32> -> vector<16x256xf32>
    %c0_21 = arith.constant 0 : index
    %c0_22 = arith.constant 0 : index
    %19 = vector.load %arg9[%c0_21, %c0_22] : memref<16x256xf32, #tpu.memory_space<vmem>>, vector<16x256xf32>
    tpu.vector_store %arg9[%c0_21, %c0_22], %18 {strides = array<i32>} : memref<16x256xf32, #tpu.memory_space<vmem>>, vector<16x256xf32>,
    %c0_23 = arith.constant 0 : index
    %c0_24 = arith.constant 0 : index
    %20 = vector.load %arg9[%c0_23, %c0_24] : memref<16x256xf32, #tpu.memory_space<vmem>>, vector<16x128xf32>
    %21 = arith.truncf %20 : vector<16x128xf32> to vector<16x128xbf16>
    %c0_25 = arith.constant 0 : index
    %c128_26 = arith.constant 128 : index
    %22 = vector.load %arg9[%c0_25, %c128_26] : memref<16x256xf32, #tpu.memory_space<vmem>>, vector<16x128xf32>
    %cst_27 = arith.constant dense<0.000000e+00> : vector<16x128xf32>
    %23 = tpu.matmul %0, %21, %cst_27 {dimension_numbers = #tpu.dot_dimension_numbers<[1], [0], [0], [1], [0, 0, 1, 1], [], []>} : vector<16x16xbf16>, vector<16x128xbf16>, vector<16x128xf32> -> vector<16x128xf32>
    %24 = arith.addf %23, %22 : vector<16x128xf32>
    %c0_28 = arith.constant 0 : index
    %c0_29 = arith.constant 0 : index
    %25 = vector.load %arg5[%c0_28, %c0_29] : memref<1x128xf32, #tpu.memory_space<vmem>>, vector<1x128xf32>
    %26 = vector.broadcast %25 : vector<1x128xf32> to vector<16x128xf32>
    %27 = arith.addf %24, %26 : vector<16x128xf32>
    %c0_30 = arith.constant 0 : index
    %c0_31 = arith.constant 0 : index
    %28 = vector.load %arg6[%c0_30, %c0_31] : memref<16x128xf32, #tpu.memory_space<vmem>>, vector<16x128xf32>
    tpu.vector_store %arg6[%c0_30, %c0_31], %27 {strides = array<i32>} : memref<16x128xf32, #tpu.memory_space<vmem>>, vector<16x128xf32>,
    return
  }
}

</mosaic_0001>

<bundles_post_ra>
// kernel: movie_recommender_forward.1
= control target key start
LH: loop header
LB: loop body
LE: loop exit
PB: predicated region body
PF: predicated region fallthrough
CT: control target
= control target key end

     0   :  { %vm40_vm0 = vcmask 130048   ;;  %s855_s0 = inlined_call_operand.vmem [shape: bf16[16,16], index: 0, kind: input, shape index: {}]   ;;  %s856_s1 = inlined_call_operand.vmem [shape: bf16[16,128], index: 1, kind: input, shape index: {}]   ;;  %s857_s2 = inlined_call_operand.vmem [shape: bf16[256,128], index: 2, kind: input, shape index: {}]   ;;  %s858_s3 = inlined_call_operand.vmem [shape: f32[1,128], index: 3, kind: input, shape index: {}]   ;;  %s859_s4 = inlined_call_operand.vmem [shape: bf16[128,256], index: 4, kind: input, shape index: {}]   ;;  %s860_s5 = inlined_call_operand.vmem [shape: f32[1,128], index: 5, kind: input, shape index: {}]   ;;  %s861_s6 = inlined_call_operand.hbm [shape: f32[16,128], index: 6, kind: output, shape index: {}]  }
   0x1   :  { %v574_v0 = vld [vmem:[%s856_s1] sm:$0xff]  ;;  %v592_v1 = vld [vmem:[%s857_s2 + $0x78] sm:$0xff]  ;;  %v591_v4 = vld [vmem:[%s857_s2 + $0x70] sm:$0xff] }
   0x2   :  { %v693_v2 = vld [vmem:[%s855_s0] sm:$0xff]  ;;  %v584_v3 = vld [vmem:[%s857_s2 + $0x38] sm:$0xff]  ;;  %51 = vmatpush.bf16.msra.mxu0 %v574_v0  ;;  %222 = vmatpush.bf16.msra.mxu2 %v592_v1  ;;  %v583_v5 = vld [vmem:[%s857_s2 + $0x30] sm:$0xff] }
   0x3   :  { %208 = vmatpush.bf16.msra.mxu1 %v584_v3 }
   0x4   :  { %11 = vsyncpa [#allocation6], 0  ;;  %v590_v6 = vld [vmem:[%s857_s2 + $0x68] sm:$0xff]  ;;  %v589_v8 = vld [vmem:[%s857_s2 + $0x60] sm:$0xff]  ;;  %s646_s21 = smov [#allocation5]   ;;  %s411_s25 = sshll.u32 %s861_s6, 4  ;;  %s412_s25 = int_to_ptr.hbm [resolvable:$true] %s411_s25 }
   0x5   :  { %431 = vmatmul.msk.bf16.vlgmr.msra.gmra.mxu0 %vm40_vm0, %v693_v2  ;;  %v582_v7 = vld [vmem:[%s857_s2 + $0x28] sm:$0xff]  ;;  %v588_v9 = vld [vmem:[%s857_s2 + $0x58] sm:$0xff]  ;;  %v587_v10 = vld [vmem:[%s857_s2 + $0x50] sm:$0xff]  ;;  %s409_s22 = sshll.u32 %s646_s21, 4  ;;  %s647_s26 = smov 128   ;;  %s410_s22 = int_to_ptr.vmem [resolvable:$true] %s409_s22 }
   0x6   :  { %223 = vmatpush.bf16.msra.mxu2 %v591_v4  ;;  %v27_v11 = vld [vmem:[%s856_s1] sm:$0xf]  ;;  %v28_v12 = vld [vmem:[%s856_s1 + $0x4] sm:$0xf]  ;;  %v586_v14 = vld [vmem:[%s857_s2 + $0x48] sm:$0xff]  ;;  %s648_s27 = smov 8  }
   0x7   :  { %209 = vmatpush.bf16.msra.mxu1 %v583_v5  ;;  %62 = vst [vmem:[#allocation2 + $0x4] sm:$0xf] %v27_v11  ;;  %v581_v13 = vld [vmem:[%s857_s2 + $0x20] sm:$0xff]  ;;  %v580_v15 = vld [vmem:[%s857_s2 + $0x18] sm:$0xff]  ;;  %v579_v20 = vld [vmem:[%s857_s2 + $0x10] sm:$0xff] }
   0x8   :  { %63 = vst [vmem:[#allocation2 + $0xc] sm:$0xf] %v28_v12  ;;  %v585_v16 = vld [vmem:[%s857_s2 + $0x40] sm:$0xff]  ;;  %v578_v21 = vld [vmem:[%s857_s2 + $0x8] sm:$0xff]  ;;  %v566_v30 = vld [vmem:[%s859_s4 + $0x70] sm:$0xf] }
   0x9   :  { %v577_v22 = vld [vmem:[%s857_s2] sm:$0xff]  ;;  %v609_v31 = vld [vmem:[%s859_s4 + $0x74] sm:$0xf0]  ;;  %v608_v32 = vld [vmem:[%s859_s4 + $0x74] sm:$0xf] }
   0xa   :  { %224 = vmatpush.bf16.msra.mxu2 %v590_v6  ;;  %v567_v33 = vor.u32 %v609_v31, %v566_v30  ;;  %v568_v34 = vld [vmem:[%s859_s4 + $0x78] sm:$0xf0]  ;;  %v558_v36 = vld [vmem:[%s859_s4 + $0x60] sm:$0xf]  ;;  %v607_v37 = vld [vmem:[%s859_s4 + $0x64] sm:$0xf0] }
   0xb   :  { %210 = vmatpush.bf16.msra.mxu1 %v582_v7  ;;  %v571_v35 = vor.u32 %v608_v32, %v568_v34  ;;  %v606_v38 = vld [vmem:[%s859_s4 + $0x64] sm:$0xf]  ;;  %v559_v39 = vor.u32 %v607_v37, %v558_v36  ;;  %v560_v40 = vld [vmem:[%s859_s4 + $0x68] sm:$0xf0]  ;;  %v550_v42 = vld [vmem:[%s859_s4 + $0x50] sm:$0xf] }
   0xc   :  { %346 = vmatpush.bf16.msra.mxu3 %v567_v33  ;;  %v563_v41 = vor.u32 %v606_v38, %v560_v40  ;;  %v605_v43 = vld [vmem:[%s859_s4 + $0x54] sm:$0xf0]  ;;  %v604_v44 = vld [vmem:[%s859_s4 + $0x54] sm:$0xf]  ;;  %v552_v46 = vld [vmem:[%s859_s4 + $0x58] sm:$0xf0] }
   0xd   :  { %360 = vmatpush.bf16.msrb.mxu0 %v571_v35  ;;  %v551_v45 = vor.u32 %v605_v43, %v550_v42  ;;  %v555_v47 = vor.u32 %v604_v44, %v552_v46  ;;  %v542_v48 = vld [vmem:[%s859_s4 + $0x40] sm:$0xf]  ;;  %v603_v49 = vld [vmem:[%s859_s4 + $0x44] sm:$0xf0]  ;;  %v602_v50 = vld [vmem:[%s859_s4 + $0x44] sm:$0xf] }
   0xe   :  { %225 = vmatpush.bf16.msra.mxu2 %v589_v8  ;;  %v575_v17 = vld [vmem:[#allocation2 + $0x4] sm:$0xf]  ;;  %v543_v51 = vor.u32 %v603_v49, %v542_v48  ;;  %v544_v52 = vld [vmem:[%s859_s4 + $0x48] sm:$0xf0]  ;;  %v534_v54 = vld [vmem:[%s859_s4 + $0x30] sm:$0xf] }
   0xf   :  { %211 = vmatpush.bf16.msra.mxu1 %v581_v13  ;;  %v436_v18 = vld [vmem:[#allocation2 + $0x8] sm:$0xf0]  ;;  %v547_v53 = vor.u32 %v602_v50, %v544_v52  ;;  %v601_v55 = vld [vmem:[%s859_s4 + $0x34] sm:$0xf0]  ;;  %v600_v56 = vld [vmem:[%s859_s4 + $0x34] sm:$0xf] }
  0x10   :  { %v439_v19 = vor.u32 %v575_v17, %v436_v18  ;;  %347 = vmatpush.bf16.msra.mxu3 %v559_v39  ;;  %v535_v57 = vor.u32 %v601_v55, %v534_v54  ;;  %v536_v58 = vld [vmem:[%s859_s4 + $0x38] sm:$0xf0]  ;;  %v526_v60 = vld [vmem:[%s859_s4 + $0x20] sm:$0xf]  ;;  %v599_v61 = vld [vmem:[%s859_s4 + $0x24] sm:$0xf0] }
  0x11   :  { %361 = vmatpush.bf16.msrb.mxu0 %v563_v41  ;;  %v539_v59 = vor.u32 %v600_v56, %v536_v58  ;;  %v598_v62 = vld [vmem:[%s859_s4 + $0x24] sm:$0xf]  ;;  %v527_v63 = vor.u32 %v599_v61, %v526_v60  ;;  %v528_v0 = vld [vmem:[%s859_s4 + $0x28] sm:$0xf0]  ;;  %v518_v3 = vld [vmem:[%s859_s4 + $0x10] sm:$0xf] }
  0x12   :  { %226 = vmatpush.bf16.msra.mxu2 %v588_v9  ;;  %v531_v1 = vor.u32 %v598_v62, %v528_v0  ;;  %v597_v4 = vld [vmem:[%s859_s4 + $0x14] sm:$0xf0]  ;;  %v596_v5 = vld [vmem:[%s859_s4 + $0x14] sm:$0xf]  ;;  %v520_v7 = vld [vmem:[%s859_s4 + $0x18] sm:$0xf0] }
  0x13   :  { %212 = vmatpush.bf16.msra.mxu1 %v580_v15  ;;  %v519_v6 = vor.u32 %v597_v4, %v518_v3  ;;  %v510_v8 = vld [vmem:[%s859_s4] sm:$0xf]  ;;  %v595_v9 = vld [vmem:[%s859_s4 + $0x4] sm:$0xf0]  ;;  %v594_v11 = vld [vmem:[%s859_s4 + $0x4] sm:$0xf] }
  0x14   :  { %348 = vmatpush.bf16.msra.mxu3 %v551_v45  ;;  %v512_v12 = vld [vmem:[%s859_s4 + $0x8] sm:$0xf0]  ;;  %v511_v13 = vor.u32 %v595_v9, %v510_v8  ;;  %v618_v17 = vld [vmem:[%s858_s3] ss:$0 sm:$0xff] }
  0x15   :  { %362 = vmatpush.bf16.msrb.mxu0 %v555_v47  ;;  %v619_v32 = vld [vmem:[%s860_s5] ss:$0 sm:$0xff] }
  0x16   :  { %227 = vmatpush.bf16.msra.mxu2 %v587_v10  ;;  %v523_v10 = vor.u32 %v596_v5, %v520_v7 }
  0x17   :  { %213 = vmatpush.bf16.msra.mxu1 %v579_v20 }
  0x18   :  { %349 = vmatpush.bf16.msra.mxu3 %v543_v51 }
  0x19   :  { %363 = vmatpush.bf16.msrb.mxu0 %v547_v53 }
  0x1a   :  { %228 = vmatpush.bf16.msra.mxu2 %v586_v14  ;;  %v515_v14 = vor.u32 %v594_v11, %v512_v12 }
  0x1b   :  { %214 = vmatpush.bf16.msra.mxu1 %v578_v21 }
  0x1c   :  { %350 = vmatpush.bf16.msra.mxu3 %v535_v57 }
  0x1d   :  { %364 = vmatpush.bf16.msrb.mxu0 %v539_v59 }
  0x1e   :  { %229 = vmatpush.bf16.msra.mxu2 %v585_v16 }
  0x1f   :  { %215 = vmatpush.bf16.msra.mxu1 %v577_v22 }
  0x20   :  { %351 = vmatpush.bf16.msra.mxu3 %v527_v63 }
  0x21   :  { %230 = vmatmul.bf16.vlgmr.msra.gmra.mxu2 %v439_v19  ;;  %365 = vmatpush.bf16.msrb.mxu0 %v531_v1 }
  0x24   :  { %352 = vmatpush.bf16.msra.mxu3 %v519_v6 }
  0x25   :  { %366 = vmatpush.bf16.msrb.mxu0 %v523_v10 }
  0x28   :  { %353 = vmatpush.bf16.msra.mxu3 %v511_v13 }
  0x29   :  { %367 = vmatpush.bf16.msrb.mxu0 %v515_v14 }
  0x82   :  { %v53_v23 = vpop.f32.mrf.mxu0 }
  0x83   :  { %v58_v24 = vpack.c.bf16 %v53_v23, %v53_v23 }
  0x85   :  { %60 = vst [vmem:[#allocation2] sm:$0xf] %v58_v24 }
  0x8a   :  { %v55_v25 = vpop.f32.mrf.mxu0 }
  0x8b   :  { %v59_v26 = vpack.c.bf16 %v55_v25, %v55_v25 }
  0x8c   :  { %v434_v27 = vld [vmem:[#allocation2] sm:$0xf] }
  0x8d   :  { %61 = vst [vmem:[#allocation2 + $0x8] sm:$0xf] %v59_v26 }
  0x94   :  { %v576_v28 = vld [vmem:[#allocation2 + $0x4] sm:$0xf0] }
  0x95   :  { %v435_v29 = vor.u32 %v576_v28, %v434_v27 }
  0x97   :  { %216 = vmatmul.bf16.vlgmr.msra.gmra.mxu1 %v435_v29 }
  0xa4   :  { %v231_v15 = vpop.f32.mrf.mxu2 }
  0xac   :  { %v233_v22 = vpop.f32.mrf.mxu2 }
 0x114   :  { %v217_v16 = vpop.f32.mrf.mxu1 }
 0x115   :  { %v218_v18 = vadd.f32 %v618_v17, %v217_v16 }
 0x117   :  { %v232_v20 = vadd.f32 %v231_v15, %v218_v18 }
 0x119   :  { %v236_v24 = vmax.f32 %v232_v20, 0.0 }
 0x11c   :  { %v219_v19 = vpop.f32.mrf.mxu1 }
 0x11d   :  { %v220_v21 = vadd.f32 %v618_v17, %v219_v19 }
 0x11f   :  { %v234_v23 = vadd.f32 %v233_v22, %v220_v21 }
 0x121   :  { %v237_v25 = vmax.f32 %v234_v23, 0.0 }
 0x123   :  { %v613_v26 = vpack.c.bf16 %v237_v25, %v236_v24 }
 0x125   :  { %614 = vst [vmem:[#allocation3] sm:$0xff] %v613_v26  }
 0x12c   :  { %v593_v27 = vld [vmem:[#allocation3] sm:$0xff] }
 0x12d   :  { %354 = vmatmul.bf16.vlgmr.msra.gmra.mxu3 %v593_v27  ;;  %368 = vmatmul.bf16.vlgmr.msrb.gmra.mxu0 %v593_v27 }
 0x1aa   :  { %v369_v31 = vpop.f32.mrf.mxu0 }
 0x1b0   :  { %v355_v28 = vpop.f32.mrf.mxu3 }
 0x1b2   :  { %v371_v36 = vpop.f32.mrf.mxu0 }
 0x1b8   :  { %v357_v29 = vpop.f32.mrf.mxu3 }
 0x1b9   :  { %v380_v30 = vpack.c.bf16 %v357_v29, %v355_v28 }
 0x1bb   :  { %390 = vmatpush.bf16.msrb.mxu1 %v380_v30 }
 0x1be   :  { %572 = vmatmul.msk.bf16.vlgmr.msrb.gmra.mxu1 %vm40_vm0, %v693_v2 }
 0x23b   :  { %v392_v33 = vpop.f32.mrf.mxu1 }
 0x23c   :  { %v393_v34 = vadd.f32 %v392_v33, %v369_v31 }
 0x23e   :  { %v401_v35 = vadd.f32 %v619_v32, %v393_v34 }
 0x240   :  { %403 = vst [vmem:[#allocation5] sm:$0xff] %v401_v35 }
 0x243   :  { %v394_v37 = vpop.f32.mrf.mxu1 }
 0x244   :  { %v395_v38 = vadd.f32 %v394_v37, %v371_v36 }
 0x246   :  { %v402_v2 = vadd.f32 %v619_v32, %v395_v38 }
 0x248   :  { %404 = vst [vmem:[#allocation5 + $0x8] sm:$0xff] %v402_v2 }
 0x249   :  { %417 = dma.vmem_to_hbm [thread:$0]  %s410_s22, 256, %s412_s25, [#allocation6], %s647_s26, %s647_s26, %s648_s27  }
 0x24a   :  { %644 = dma.done.wait [#allocation6], 256  }
 0x24b   :  { %645 = vsyncadd [#allocation6], 4294967040 }
 0x24c   :  { %422 = vsyncpa [#allocation6], 1 }

</bundles_post_ra>
